<compile_context>
chip_gen: v7x
topology: tpu7x:2x2x1
jax: 0.10.0
libtpu: 0.0.40
codegen_flags: <defaults>
</compile_context>

<pallas_src>
import functools

import jax
import jax.numpy as jnp
from jax.experimental import pallas as pl
from jax.experimental.pallas import tpu as pltpu

_INV_SQRT2 = 0.7071067811865476  # 1/sqrt(2)


def _projection_head_kernel(x_ref, w1_ref, b1_ref, w2_ref, b2_ref,
                            gamma_ref, beta_ref, o_ref,
                            *, eps, mxu_dtype, inv_dp, approx_gelu):
    # In-kernel cast of the x tile (no wrapper-side HBM pass over x).
    x = x_ref[...].astype(mxu_dtype)

    # ---- Linear 1 : (tb, Din) @ (Din, Dp) + (1, Dp), f32 accumulation ----
    h = jnp.dot(x, w1_ref[...], preferred_element_type=jnp.float32)
    h = h + b1_ref[...]

    # ---- GELU ----
    if approx_gelu:
        # tanh approximation -> transcendental lands on the (otherwise idle)
        # EUP slot on v6e/v7x. Slightly deviates from torch's exact-erf default.
        h = jax.nn.gelu(h, approximate=True)
    else:
        # Exact erf GELU (matches torch.nn.GELU() default), f32 on the VPU.
        h = 0.5 * h * (1.0 + jax.lax.erf(h * _INV_SQRT2))

    # ---- Linear 2 : (tb, Dp) @ (Dp, Dp) + (1, Dp) ----
    y = jnp.dot(h.astype(mxu_dtype), w2_ref[...],
                preferred_element_type=jnp.float32)
    y = y + b2_ref[...]

    # ---- Dropout: identity in eval mode ----

    # ---- LayerNorm over last dim, single fused statistics pass:
    #      mean = E[y], var = E[y^2] - mean^2 (biased variance, torch semantics).
    #      The two sums are independent, so the XLU reductions overlap.
    s1 = jnp.sum(y, axis=-1, keepdims=True)
    s2 = jnp.sum(y * y, axis=-1, keepdims=True)
    mean = s1 * inv_dp
    var = jnp.maximum(s2 * inv_dp - mean * mean, 0.0)
    scale = jax.lax.rsqrt(var + eps) * gamma_ref[...]   # gamma fused into scale
    o_ref[...] = ((y - mean) * scale + beta_ref[...]).astype(o_ref.dtype)


def _round_up(x, m):
    return ((x + m - 1) // m) * m


def projection_head_forward(x, w1, b1, w2, b2, gamma, beta,
                            *, eps=1e-5, tile_b=512,
                            mxu_dtype=jnp.bfloat16,
                            approx_gelu=False,
                            out_dtype=None):
    """x: [B, Din].  w1: [Din, Dp], w2: [Dp, Dp] (pre-transposed vs. torch weight)."""
    B, Din = x.shape
    Dp = w1.shape[1]
    out_dtype = x.dtype if out_dtype is None else out_dtype

    # Batch tile: large enough to amortize per-grid-step overhead, never larger
    # than the batch rounded to a sublane multiple. If the whole batch fits in
    # one step and B is big enough, split into two steps so both TensorCores
    # on a v7x chip get work via the "parallel" grid axis.
    tile_b_eff = min(tile_b, _round_up(B, 8))
    if B >= 16 and pl.cdiv(B, tile_b_eff) == 1:
        tile_b_eff = _round_up(pl.cdiv(B, 2), 8)
    grid = (pl.cdiv(B, tile_b_eff),)

    # Weights are tiny and grid-resident: cast once in the wrapper.
    w1_m = w1.astype(mxu_dtype)
    w2_m = w2.astype(mxu_dtype)

    # Keep 1-D params 2-D so they map cleanly onto (sublane, lane); stay f32.
    b1_2d = b1.reshape(1, Dp).astype(jnp.float32)
    b2_2d = b2.reshape(1, Dp).astype(jnp.float32)
    gamma_2d = gamma.reshape(1, Dp).astype(jnp.float32)
    beta_2d = beta.reshape(1, Dp).astype(jnp.float32)

    kernel = functools.partial(
        _projection_head_kernel,
        eps=eps, mxu_dtype=mxu_dtype, inv_dp=1.0 / Dp, approx_gelu=approx_gelu)

    w_itemsize = jnp.dtype(mxu_dtype).itemsize
    cost = pl.CostEstimate(
        flops=2 * B * (Din * Dp + Dp * Dp),
        transcendentals=B * Dp,                            # one erf/tanh per h element
        bytes_accessed=(B * Din * x.dtype.itemsize         # x (read as stored)
                        + Din * Dp * w_itemsize            # W1
                        + Dp * Dp * w_itemsize             # W2
                        + 4 * Dp * 4                       # b1, b2, gamma, beta (f32)
                        + B * Dp * jnp.dtype(out_dtype).itemsize))  # out

    out = pl.pallas_call(
        kernel,
        out_shape=jax.ShapeDtypeStruct((B, Dp), out_dtype),
        grid_spec=pl.GridSpec(
            grid=grid,
            in_specs=[
                pl.BlockSpec((tile_b_eff, Din), lambda i: (i, 0)),  # x tile (streamed)
                pl.BlockSpec((Din, Dp), lambda i: (0, 0)),          # W1 (resident)
                pl.BlockSpec((1, Dp), lambda i: (0, 0)),            # b1
                pl.BlockSpec((Dp, Dp), lambda i: (0, 0)),           # W2 (resident)
                pl.BlockSpec((1, Dp), lambda i: (0, 0)),            # b2
                pl.BlockSpec((1, Dp), lambda i: (0, 0)),            # gamma
                pl.BlockSpec((1, Dp), lambda i: (0, 0)),            # beta
            ],
            out_specs=pl.BlockSpec((tile_b_eff, Dp), lambda i: (i, 0)),
        ),
        compiler_params=pltpu.CompilerParams(
            dimension_semantics=("parallel",),
            vmem_limit_bytes=32 << 20,
        ),
        cost_estimate=cost,
    )(x, w1_m, b1_2d, w2_m, b2_2d, gamma_2d, beta_2d)

    return out


def _reference(x, w1, b1, w2, b2, gamma, beta, eps=1e-5):
    h = x @ w1 + b1
    h = jax.nn.gelu(h, approximate=False)
    y = h @ w2 + b2
    mean = y.mean(-1, keepdims=True)
    var = ((y - mean) ** 2).mean(-1, keepdims=True)
    return (y - mean) / jnp.sqrt(var + eps) * gamma + beta


if __name__ == "__main__":
    # Shapes consistent with the module: input_dim=64, projection_dim=128.
    B, Din, Dp = 8, 64, 128

    key = jax.random.PRNGKey(0)
    kx, kw1, kb1, kw2, kb2 = jax.random.split(key, 5)

    x = jax.random.normal(kx, (B, Din), dtype=jnp.float32)

    # Deterministic parameter init (mimicking nn.Linear's uniform init ranges).
    lim1 = 1.0 / jnp.sqrt(jnp.float32(Din))
    w1 = jax.random.uniform(kw1, (Din, Dp), jnp.float32, -lim1, lim1)
    b1 = jax.random.uniform(kb1, (Dp,), jnp.float32, -lim1, lim1)
    lim2 = 1.0 / jnp.sqrt(jnp.float32(Dp))
    w2 = jax.random.uniform(kw2, (Dp, Dp), jnp.float32, -lim2, lim2)
    b2 = jax.random.uniform(kb2, (Dp,), jnp.float32, -lim2, lim2)
    gamma = jnp.ones((Dp,), jnp.float32)   # nn.LayerNorm defaults
    beta = jnp.zeros((Dp,), jnp.float32)

    # 1) f32 MXU path, single-block grid — tight match to the reference.
    ref = _reference(x, w1, b1, w2, b2, gamma, beta)
    out_f32 = projection_head_forward(x, w1, b1, w2, b2, gamma, beta,
                                      mxu_dtype=jnp.float32)
    out_f32 = jax.block_until_ready(out_f32)
    assert out_f32.shape == (B, Dp)
    assert jnp.allclose(out_f32, ref, atol=1e-4, rtol=1e-4), "f32 path mismatch"

    # 2) Default bf16-MXU path on a ragged batch — exercises the cdiv grid with
    #    a partial (masked) last block and the >=2-step megacore split,
    #    looser tolerance for bf16 MXU inputs.
    B2 = 200
    x2 = jax.random.normal(jax.random.PRNGKey(1), (B2, Din), dtype=jnp.float32)
    ref2 = _reference(x2, w1, b1, w2, b2, gamma, beta)
    out_bf16 = projection_head_forward(x2, w1, b1, w2, b2, gamma, beta)
    out_bf16 = jax.block_until_ready(out_bf16)
    assert out_bf16.shape == (B2, Dp)
    assert jnp.allclose(out_bf16, ref2, atol=5e-2, rtol=5e-2), "bf16 path mismatch"

    print("KERNEL_OK")
</pallas_src>

<mosaic_0001>
module attributes {stable_mosaic.version = 11 : i64} {
  func.func @_projection_head_kernel(%arg0: i32, %arg1: memref<8x64xf32, #tpu.memory_space<vmem>>, %arg2: memref<64x128xf32, #tpu.memory_space<vmem>>, %arg3: memref<1x128xf32, #tpu.memory_space<vmem>>, %arg4: memref<128x128xf32, #tpu.memory_space<vmem>>, %arg5: memref<1x128xf32, #tpu.memory_space<vmem>>, %arg6: memref<1x128xf32, #tpu.memory_space<vmem>>, %arg7: memref<1x128xf32, #tpu.memory_space<vmem>>, %arg8: memref<8x128xf32, #tpu.memory_space<vmem>>) attributes {dimension_semantics = [#tpu.dimension_semantics<parallel>], iteration_bounds = array<i64: 1>, scalar_prefetch = 0 : i64, scratch_operands = 0 : i64, tpu.core_type = #tpu.core_type<tc>, window_params = [{transform_indices = @transform_0, window_bounds = array<i64: 8, 64>}, {pipeline_mode = #tpu.pipeline_mode<synchronous>, transform_indices = @transform_1, window_bounds = array<i64: 64, 128>}, {pipeline_mode = #tpu.pipeline_mode<synchronous>, transform_indices = @transform_2, window_bounds = array<i64: 1, 128>}, {pipeline_mode = #tpu.pipeline_mode<synchronous>, transform_indices = @transform_3, window_bounds = array<i64: 128, 128>}, {pipeline_mode = #tpu.pipeline_mode<synchronous>, transform_indices = @transform_4, window_bounds = array<i64: 1, 128>}, {pipeline_mode = #tpu.pipeline_mode<synchronous>, transform_indices = @transform_5, window_bounds = array<i64: 1, 128>}, {pipeline_mode = #tpu.pipeline_mode<synchronous>, transform_indices = @transform_6, window_bounds = array<i64: 1, 128>}, {transform_indices = @transform_7, window_bounds = array<i64: 8, 128>}]} {
    %c0 = arith.constant 0 : index
    %c0_0 = arith.constant 0 : index
    %0 = vector.load %arg1[%c0, %c0_0] : memref<8x64xf32, #tpu.memory_space<vmem>>, vector<8x64xf32>
    %c0_1 = arith.constant 0 : index
    %c0_2 = arith.constant 0 : index
    %1 = vector.load %arg2[%c0_1, %c0_2] : memref<64x128xf32, #tpu.memory_space<vmem>>, vector<64x128xf32>
    %cst = arith.constant dense<0.000000e+00> : vector<8x128xf32>
    %2 = tpu.matmul %0, %1, %cst {dimension_numbers = #tpu.dot_dimension_numbers<[1], [0], [0], [1], [0, 0, 1, 1], [], []>} : vector<8x64xf32>, vector<64x128xf32>, vector<8x128xf32> -> vector<8x128xf32>
    %c0_3 = arith.constant 0 : index
    %c0_4 = arith.constant 0 : index
    %3 = vector.load %arg3[%c0_3, %c0_4] : memref<1x128xf32, #tpu.memory_space<vmem>>, vector<1x128xf32>
    %4 = vector.broadcast %3 : vector<1x128xf32> to vector<8x128xf32>
    %5 = arith.addf %2, %4 : vector<8x128xf32>
    %cst_5 = arith.constant 5.000000e-01 : f32
    %6 = vector.broadcast %cst_5 : f32 to vector<8x128xf32>
    %7 = arith.mulf %6, %5 : vector<8x128xf32>
    %cst_6 = arith.constant 0.707106769 : f32
    %8 = vector.broadcast %cst_6 : f32 to vector<8x128xf32>
    %9 = arith.mulf %5, %8 : vector<8x128xf32>
    %10 = math.erf %9 : vector<8x128xf32>
    %cst_7 = arith.constant 1.000000e+00 : f32
    %11 = vector.broadcast %cst_7 : f32 to vector<8x128xf32>
    %12 = arith.addf %11, %10 : vector<8x128xf32>
    %13 = arith.mulf %7, %12 : vector<8x128xf32>
    %c0_8 = arith.constant 0 : index
    %c0_9 = arith.constant 0 : index
    %14 = vector.load %arg4[%c0_8, %c0_9] : memref<128x128xf32, #tpu.memory_space<vmem>>, vector<128x128xf32>
    %cst_10 = arith.constant dense<0.000000e+00> : vector<8x128xf32>
    %15 = tpu.matmul %13, %14, %cst_10 {dimension_numbers = #tpu.dot_dimension_numbers<[1], [0], [0], [1], [0, 0, 1, 1], [], []>} : vector<8x128xf32>, vector<128x128xf32>, vector<8x128xf32> -> vector<8x128xf32>
    %c0_11 = arith.constant 0 : index
    %c0_12 = arith.constant 0 : index
    %16 = vector.load %arg5[%c0_11, %c0_12] : memref<1x128xf32, #tpu.memory_space<vmem>>, vector<1x128xf32>
    %17 = vector.broadcast %16 : vector<1x128xf32> to vector<8x128xf32>
    %18 = arith.addf %15, %17 : vector<8x128xf32>
    %cst_13 = arith.constant dense<0.000000e+00> : vector<8xf32>
    %19 = vector.multi_reduction <add>, %18, %cst_13 [1] : vector<8x128xf32> to vector<8xf32>
    %20 = vector.shape_cast %19 : vector<8xf32> to vector<8x1xf32>
    %21 = arith.mulf %18, %18 : vector<8x128xf32>
    %cst_14 = arith.constant dense<0.000000e+00> : vector<8xf32>
    %22 = vector.multi_reduction <add>, %21, %cst_14 [1] : vector<8x128xf32> to vector<8xf32>
    %23 = vector.shape_cast %22 : vector<8xf32> to vector<8x1xf32>
    %cst_15 = arith.constant 7.812500e-03 : f32
    %24 = vector.broadcast %cst_15 : f32 to vector<8x1xf32>
    %25 = arith.mulf %20, %24 : vector<8x1xf32>
    %cst_16 = arith.constant 7.812500e-03 : f32
    %26 = vector.broadcast %cst_16 : f32 to vector<8x1xf32>
    %27 = arith.mulf %23, %26 : vector<8x1xf32>
    %28 = arith.mulf %25, %25 : vector<8x1xf32>
    %29 = arith.subf %27, %28 : vector<8x1xf32>
    %cst_17 = arith.constant 0.000000e+00 : f32
    %30 = vector.broadcast %cst_17 : f32 to vector<8x1xf32>
    %31 = arith.maximumf %29, %30 : vector<8x1xf32>
    %cst_18 = arith.constant 9.99999974E-6 : f32
    %32 = vector.broadcast %cst_18 : f32 to vector<8x1xf32>
    %33 = arith.addf %31, %32 : vector<8x1xf32>
    %34 = math.rsqrt %33 : vector<8x1xf32>
    %c0_19 = arith.constant 0 : index
    %c0_20 = arith.constant 0 : index
    %35 = vector.load %arg6[%c0_19, %c0_20] : memref<1x128xf32, #tpu.memory_space<vmem>>, vector<1x128xf32>
    %36 = vector.broadcast %34 : vector<8x1xf32> to vector<8x128xf32>
    %37 = vector.broadcast %35 : vector<1x128xf32> to vector<8x128xf32>
    %38 = arith.mulf %36, %37 : vector<8x128xf32>
    %39 = vector.broadcast %25 : vector<8x1xf32> to vector<8x128xf32>
    %40 = arith.subf %18, %39 : vector<8x128xf32>
    %41 = arith.mulf %40, %38 : vector<8x128xf32>
    %c0_21 = arith.constant 0 : index
    %c0_22 = arith.constant 0 : index
    %42 = vector.load %arg7[%c0_21, %c0_22] : memref<1x128xf32, #tpu.memory_space<vmem>>, vector<1x128xf32>
    %43 = vector.broadcast %42 : vector<1x128xf32> to vector<8x128xf32>
    %44 = arith.addf %41, %43 : vector<8x128xf32>
    %c0_23 = arith.constant 0 : index
    %c0_24 = arith.constant 0 : index
    %45 = vector.load %arg8[%c0_23, %c0_24] : memref<8x128xf32, #tpu.memory_space<vmem>>, vector<8x128xf32>
    tpu.vector_store %arg8[%c0_23, %c0_24], %44 {strides = array<i32>} : memref<8x128xf32, #tpu.memory_space<vmem>>, vector<8x128xf32>,
    return
  }
  func.func @transform_0(%arg0: i32) -> (i32, i32) {
    %c0_i32 = arith.constant 0 : i32
    %c0_i32_0 = arith.constant 0 : i32
    return %arg0, %c0_i32 : i32, i32
  }
  func.func @transform_1(%arg0: i32) -> (i32, i32) {
    %c0_i32 = arith.constant 0 : i32
    %c0_i32_0 = arith.constant 0 : i32
    %c0_i32_1 = arith.constant 0 : i32
    return %c0_i32, %c0_i32_0 : i32, i32
  }
  func.func @transform_2(%arg0: i32) -> (i32, i32) {
    %c0_i32 = arith.constant 0 : i32
    %c0_i32_0 = arith.constant 0 : i32
    %c0_i32_1 = arith.constant 0 : i32
    return %c0_i32, %c0_i32_0 : i32, i32
  }
  func.func @transform_3(%arg0: i32) -> (i32, i32) {
    %c0_i32 = arith.constant 0 : i32
    %c0_i32_0 = arith.constant 0 : i32
    %c0_i32_1 = arith.constant 0 : i32
    return %c0_i32, %c0_i32_0 : i32, i32
  }
  func.func @transform_4(%arg0: i32) -> (i32, i32) {
    %c0_i32 = arith.constant 0 : i32
    %c0_i32_0 = arith.constant 0 : i32
    %c0_i32_1 = arith.constant 0 : i32
    return %c0_i32, %c0_i32_0 : i32, i32
  }
  func.func @transform_5(%arg0: i32) -> (i32, i32) {
    %c0_i32 = arith.constant 0 : i32
    %c0_i32_0 = arith.constant 0 : i32
    %c0_i32_1 = arith.constant 0 : i32
    return %c0_i32, %c0_i32_0 : i32, i32
  }
  func.func @transform_6(%arg0: i32) -> (i32, i32) {
    %c0_i32 = arith.constant 0 : i32
    %c0_i32_0 = arith.constant 0 : i32
    %c0_i32_1 = arith.constant 0 : i32
    return %c0_i32, %c0_i32_0 : i32, i32
  }
  func.func @transform_7(%arg0: i32) -> (i32, i32) {
    %c0_i32 = arith.constant 0 : i32
    %c0_i32_0 = arith.constant 0 : i32
    return %arg0, %c0_i32 : i32, i32
  }
}

</mosaic_0001>

<bundles_post_ra>
// kernel: tpu_custom_call.1
= control target key start
LH: loop header
LB: loop body
LE: loop exit
PB: predicated region body
PF: predicated region fallthrough
CT: control target
= control target key end

     0   :  { %12 = vsyncpa [#allocation3], 0  ;;  %s644_s0 = inlined_call_operand.hbm [shape: f32[8,64], index: 0, kind: input, shape index: {}]   ;;  %s645_s1 = inlined_call_operand.hbm [shape: f32[64,128], index: 1, kind: input, shape index: {}]   ;;  %s646_s2 = inlined_call_operand.vmem [shape: f32[1,128], index: 2, kind: input, shape index: {}]   ;;  %s647_s3 = inlined_call_operand.hbm [shape: f32[128,128], index: 3, kind: input, shape index: {}]   ;;  %s648_s4 = inlined_call_operand.vmem [shape: f32[1,128], index: 4, kind: input, shape index: {}]   ;;  %s649_s5 = inlined_call_operand.vmem [shape: f32[1,128], index: 5, kind: input, shape index: {}]   ;;  %s650_s6 = inlined_call_operand.vmem [shape: f32[1,128], index: 6, kind: input, shape index: {}]   ;;  %s651_s7 = inlined_call_operand.hbm [shape: f32[8,128], index: 7, kind: output, shape index: {}]  }
   0x1   :  { %13 = vsyncpa [#allocation6], 0 }
   0x2   :  { %14 = vsyncpa [#allocation4], 0  ;;  %s529_s24 = smov [#allocation5]   ;;  %s435_s28 = scalar_lea.hbm %s645_s1, 1024 }
   0x3   :  { %s30_s25 = sshll.u32 %s529_s24, 4  ;;  %p436_p0 = scmp.ne.s32.totalorder %s645_s1, %s435_s28  ;;  %s31_s25 = int_to_ptr.vmem [resolvable:$true] %s30_s25 }
   0x4   :  { %p439_p1 = scmp.lt.u32.totalorder %s435_s28, %s645_s1 }
   0x6   :  { %p441_p2 = pnand %p439_p1, %p436_p0 }
   0x8   :  { %444 = shalt.err (!%p441_p2)
}
   0x9   :  { %s445_s10 = scalar_lea.vmem %s31_s25, 1024  ;;  %p450_p4 = scmp.lt.s32.totalorder %s31_s25, %s31_s25 }
   0xa   :  { %p446_p3 = scmp.ne.s32.totalorder %s31_s25, %s445_s10  ;;  %p451_p5 = scmp.lt.s32.totalorder %s445_s10, %s445_s10 }
   0xc   :  { %p452_p6 = por %p451_p5, %p450_p4 }
   0xe   :  { %p453_p7 = pnand %p452_p6, %p446_p3 }
  0x10   :  { %456 = shalt.err (!%p453_p7)
}
  0x11   :  { %s530_s11 = smov 128   ;;  %s531_s12 = smov 8  }
  0x12   :  { %36 = dma.hbm_to_vmem [thread:$0]  %s645_s1, 1024, %s31_s25, [#allocation6], %s530_s11, %s530_s11, %s531_s12  }
  0x13   :  { %s532_s15 = smov [#allocation2]   ;;  %s533_s17 = smov [#allocation7]  }
  0x14   :  { %s21_s16 = sshll.u32 %s532_s15, 4  ;;  %s44_s18 = sshll.u32 %s533_s17, 4  ;;  %s22_s16 = int_to_ptr.vmem [resolvable:$true] %s21_s16  ;;  %s45_s18 = int_to_ptr.vmem [resolvable:$true] %s44_s18 }
  0x15   :  { %s457_s21 = scalar_lea.hbm %s644_s0, 128 }
  0x16   :  { %p458_p8 = scmp.ne.s32.totalorder %s644_s0, %s457_s21  ;;  %p461_p9 = scmp.lt.u32.totalorder %s457_s21, %s644_s0 }
  0x18   :  { %p463_p10 = pnand %p461_p9, %p458_p8 }
  0x1a   :  { %466 = shalt.err (!%p463_p10)
}
  0x1b   :  { %s467_s1 = scalar_lea.vmem %s22_s16, 128  ;;  %p472_p12 = scmp.lt.s32.totalorder %s22_s16, %s22_s16 }
  0x1c   :  { %p468_p11 = scmp.ne.s32.totalorder %s22_s16, %s467_s1  ;;  %p473_p13 = scmp.lt.s32.totalorder %s467_s1, %s467_s1 }
  0x1e   :  { %p474_p0 = por %p473_p13, %p472_p12 }
  0x20   :  { %p475_p1 = pnand %p474_p0, %p468_p11 }
  0x22   :  { %478 = shalt.err (!%p475_p1)
}
  0x23   :  { %24 = dma.hbm_to_vmem [thread:$0]  %s644_s0, 128, %s22_s16, [#allocation3]  }
  0x24   :  { %s479_s30 = scalar_lea.hbm %s647_s3, 2048 }
  0x25   :  { %p480_p2 = scmp.ne.s32.totalorder %s647_s3, %s479_s30  ;;  %p483_p3 = scmp.lt.u32.totalorder %s479_s30, %s647_s3 }
  0x27   :  { %p485_p4 = pnand %p483_p3, %p480_p2 }
  0x29   :  { %488 = shalt.err (!%p485_p4)
}
  0x2a   :  { %s489_s14 = scalar_lea.vmem %s45_s18, 2048  ;;  %p494_p6 = scmp.lt.s32.totalorder %s45_s18, %s45_s18 }
  0x2b   :  { %p490_p5 = scmp.ne.s32.totalorder %s45_s18, %s489_s14  ;;  %p495_p7 = scmp.lt.s32.totalorder %s489_s14, %s489_s14 }
  0x2d   :  { %p496_p8 = por %p495_p7, %p494_p6 }
  0x2f   :  { %p497_p9 = pnand %p496_p8, %p490_p5 }
  0x31   :  { %500 = shalt.err (!%p497_p9)
}
  0x32   :  { %50 = dma.hbm_to_vmem [thread:$0]  %s647_s3, 2048, %s45_s18, [#allocation6], %s530_s11, %s530_s11, %s531_s12  }
  0x33   :  { %523 = dma.done.wait [#allocation3], 128  }
  0x34   :  { %524 = vsyncadd [#allocation3], 4294967168 }
  0x35   :  { %525 = dma.done.wait [#allocation6], 3072  }
  0x36   :  { %526 = vsyncadd [#allocation6], 4294964224  ;;  %v534_v0 = vmov 0.0|0.0   ;;  %vm535_vm0 = vmmov 0   ;;  %v536_v1 = vmov 0.0   ;;  %v67_v2 = vld [vmem:[#allocation5] sm:$0xff] }
  0x37   :  { %386 = vmatprep.subr.bf16.mxu0 %v534_v0  ;;  %348 = vmatprep.mubr.msk.f32.mxu0 %vm535_vm0, %v536_v1  ;;  %v68_v3 = vld [vmem:[#allocation5 + $0x8] sm:$0xff]  ;;  %v69_v4 = vld [vmem:[#allocation5 + $0x10] sm:$0xff]  ;;  %v70_v6 = vld [vmem:[#allocation5 + $0x18] sm:$0xff]  ;;  %vm82_vm1 = vcmask 523264   ;;  %s537_s19 = smov [#allocation8]  }
  0x38   :  { %398 = vmatprep.subr.bf16.mxu1 %v534_v0  ;;  %383 = vmatprep.mubr.msk.f32.mxu1 %vm535_vm0, %v536_v1  ;;  %v387_v5 = vpack.c.bf16 %v68_v3, %v67_v2  ;;  %v390_v7 = vpack.c.bf16 %v70_v6, %v69_v4  ;;  %v161_v8 = vld [vmem:[#allocation7] sm:$0xff]  ;;  %v162_v9 = vld [vmem:[#allocation7 + $0x8] sm:$0xff]  ;;  %v163_v10 = vld [vmem:[#allocation7 + $0x10] sm:$0xff]  ;;  %s291_s20 = sshll.u32 %s537_s19, 4  ;;  %s292_s20 = int_to_ptr.vmem [resolvable:$true] %s291_s20 }
  0x39   :  { %v71_v11 = vld [vmem:[#allocation5 + $0x20] sm:$0xff]  ;;  %v72_v12 = vld [vmem:[#allocation5 + $0x28] sm:$0xff]  ;;  %v399_v13 = vpack.c.bf16 %v162_v9, %v161_v8  ;;  %v164_v14 = vld [vmem:[#allocation7 + $0x18] sm:$0xff]  ;;  %s501_s21 = scalar_lea.vmem %s292_s20, 128  ;;  %p506_p11 = scmp.lt.s32.totalorder %s292_s20, %s292_s20 }
  0x3a   :  { %388 = vmatpush3.bf16.msra.mxu0 %v387_v5  ;;  %v402_v15 = vpack.c.bf16 %v164_v14, %v163_v10  ;;  %v393_v16 = vpack.c.bf16 %v72_v12, %v71_v11  ;;  %v165_v17 = vld [vmem:[#allocation7 + $0x20] sm:$0xff]  ;;  %v166_v18 = vld [vmem:[#allocation7 + $0x28] sm:$0xff]  ;;  %v73_v19 = vld [vmem:[#allocation5 + $0x30] sm:$0xff]  ;;  %p502_p10 = scmp.ne.s32.totalorder %s292_s20, %s501_s21  ;;  %p507_p12 = scmp.lt.s32.totalorder %s501_s21, %s501_s21 }
  0x3b   :  { %389 = vmatprep.subr.bf16.mxu0 %v534_v0  ;;  %400 = vmatpush3.bf16.msra.mxu1 %v399_v13  ;;  %v74_v20 = vld [vmem:[#allocation5 + $0x38] sm:$0xff]  ;;  %v405_v21 = vpack.c.bf16 %v166_v18, %v165_v17  ;;  %v167_v24 = vld [vmem:[#allocation7 + $0x30] sm:$0xff]  ;;  %v169_v27 = vld [vmem:[#allocation7 + $0x40] sm:$0xff] }
  0x3c   :  { %401 = vmatprep.subr.bf16.mxu1 %v534_v0  ;;  %v396_v22 = vpack.c.bf16 %v74_v20, %v73_v19  ;;  %v66_v23 = vld [vmem:[#allocation2] sm:$0xff]  ;;  %v170_v28 = vld [vmem:[#allocation7 + $0x48] sm:$0xff]  ;;  %v171_v30 = vld [vmem:[#allocation7 + $0x50] sm:$0xff]  ;;  %p508_p13 = por %p507_p12, %p506_p11 }
  0x3d   :  { %v168_v25 = vld [vmem:[#allocation7 + $0x38] sm:$0xff]  ;;  %v411_v29 = vpack.c.bf16 %v170_v28, %v169_v27  ;;  %v173_v33 = vld [vmem:[#allocation7 + $0x60] sm:$0xff]  ;;  %v174_v34 = vld [vmem:[#allocation7 + $0x68] sm:$0xff] }
  0x3e   :  { %391 = vmatpush3.bf16.msra.mxu0 %v390_v7  ;;  %v408_v26 = vpack.c.bf16 %v168_v25, %v167_v24  ;;  %v172_v31 = vld [vmem:[#allocation7 + $0x58] sm:$0xff]  ;;  %v417_v35 = vpack.c.bf16 %v174_v34, %v173_v33  ;;  %v175_v36 = vld [vmem:[#allocation7 + $0x70] sm:$0xff]  ;;  %p509_p0 = pnand %p508_p13, %p502_p10 }
  0x3f   :  { %392 = vmatprep.subr.bf16.mxu0 %v534_v0  ;;  %403 = vmatpush3.bf16.msra.mxu1 %v402_v15  ;;  %v414_v32 = vpack.c.bf16 %v172_v31, %v171_v30  ;;  %v176_v37 = vld [vmem:[#allocation7 + $0x78] sm:$0xff] }
  0x40   :  { %404 = vmatprep.subr.bf16.mxu1 %v534_v0  ;;  %v420_v38 = vpack.c.bf16 %v176_v37, %v175_v36  ;;  %v301_v39 = vld [vmem:[%s646_s2] ss:$0 sm:$0xff] }
  0x41   :  { %v303_v48 = vld [vmem:[%s648_s4] ss:$0 sm:$0xff] }
  0x42   :  { %394 = vmatpush3.bf16.msra.mxu0 %v393_v16  ;;  %v304_v61 = vld [vmem:[%s649_s5] ss:$0 sm:$0xff] }
  0x43   :  { %395 = vmatprep.subr.bf16.mxu0 %v534_v0  ;;  %406 = vmatpush3.bf16.msra.mxu1 %v405_v21  ;;  %v305_v1 = vld [vmem:[%s650_s6] ss:$0 sm:$0xff] }
  0x44   :  { %407 = vmatprep.subr.bf16.mxu1 %v534_v0 }
  0x46   :  { %397 = vmatpush3.bf16.msra.mxu0 %v396_v22 }
  0x47   :  { %409 = vmatpush3.bf16.msra.mxu1 %v408_v26 }
  0x48   :  { %410 = vmatprep.subr.bf16.mxu1 %v534_v0 }
  0x49   :  { %349 = vmatmul.mubr.msk.f32.vlgmr.msra.gmra.mrb[0].mxu0 %vm82_vm1, %v66_v23 }
  0x4b   :  { %412 = vmatpush3.bf16.msra.mxu1 %v411_v29 }
  0x4c   :  { %413 = vmatprep.subr.bf16.mxu1 %v534_v0 }
  0x4f   :  { %415 = vmatpush3.bf16.msra.mxu1 %v414_v32 }
  0x50   :  { %416 = vmatprep.subr.bf16.mxu1 %v534_v0 }
  0x53   :  { %418 = vmatpush3.bf16.msra.mxu1 %v417_v35 }
  0x54   :  { %419 = vmatprep.subr.bf16.mxu1 %v534_v0 }
  0x57   :  { %421 = vmatpush3.bf16.msra.mxu1 %v420_v38 }
 0x11c   :  { %v152_v40 = vpop.f32.mrb[0].mxu0 }
 0x11d   :  { %v153_v41 = vadd.f32 %v301_v39, %v152_v40  ;;  %v350_v42 = vpop.f32.mrb[1].mxu0 }
 0x11f   :  { %v157_v43 = vmul.f32 0.70710677, %v153_v41  ;;  %v156_v45 = vmul.f32 0.5, %v153_v41 }
 0x121   :  { %431 = verf.f32 %v157_v43 }
 0x12b   :  { %v432_v44 = vpop.eup %431 }
 0x12c   :  { %v159_v46 = vadd.f32 1.0, %v432_v44 }
 0x12e   :  { %v160_v47 = vmul.f32 %v159_v46, %v156_v45 }
 0x130   :  { %384 = vmatmul.mubr.f32.vlgmr.msra.gmra.mrb[0].mxu1 %v160_v47 }
 0x203   :  { %v250_v49 = vpop.f32.mrb[0].mxu1 }
 0x204   :  { %v251_v50 = vadd.f32 %v303_v48, %v250_v49  ;;  %v385_v51 = vpop.f32.mrb[1].mxu1 }
 0x206   :  { %254 = vadd.xlane.f32.xlu0 %v251_v50  ;;  %v256_v52 = vmul.f32 %v251_v50, %v251_v50 }
 0x20a   :  { %257 = vadd.xlane.f32.xlu0 %v256_v52 }
 0x293   :  { %v255_v53 = vpop.xlane.xlu0 %254 }
 0x294   :  { %v259_v54 = vmul.f32 0.0078125, %v255_v53 }
 0x296   :  { %v261_v56 = vmul.f32 %v259_v54, %v259_v54  ;;  %v274_v63 = vsub.f32 %v251_v50, %v259_v54 }
 0x297   :  { %v258_v55 = vpop.xlane.xlu0 %257 }
 0x298   :  { %v260_v57 = vmul.f32 0.0078125, %v258_v55 }
 0x29a   :  { %v262_v58 = vsub.f32 %v260_v57, %v261_v56 }
 0x29c   :  { %v263_v59 = vmax.f32 %v262_v58, 0.0 }
 0x29e   :  { %v264_v60 = vadd.f32 1e-05, %v263_v59 }
 0x2a0   :  { %433 = vrsqrt.f32 %v264_v60 }
 0x2aa   :  { %v434_v62 = vpop.eup %433 }
 0x2ab   :  { %v273_v0 = vmul.f32 %v434_v62, %v304_v61 }
 0x2ad   :  { %v275_v2 = vmul.f32 %v274_v63, %v273_v0 }
 0x2af   :  { %v283_v3 = vadd.f32 %v305_v1, %v275_v2 }
 0x2b1   :  { %284 = vst [vmem:[#allocation8] sm:$0xff] %v283_v3 }
 0x2b2   :  { %512 = shalt.err (!%p509_p0)
}
 0x2b3   :  { %s513_s23 = scalar_lea.hbm %s651_s7, 128 }
 0x2b4   :  { %p514_p1 = scmp.ne.s32.totalorder %s651_s7, %s513_s23  ;;  %p517_p2 = scmp.lt.u32.totalorder %s513_s23, %s651_s7 }
 0x2b6   :  { %p519_p3 = pnand %p517_p2, %p514_p1 }
 0x2b8   :  { %522 = shalt.err (!%p519_p3)
}
 0x2b9   :  { %294 = dma.vmem_to_hbm [thread:$0]  %s292_s20, 128, %s651_s7, [#allocation4]  }
 0x2ba   :  { %527 = dma.done.wait [#allocation4], 128  }
 0x2bb   :  { %528 = vsyncadd [#allocation4], 4294967168 }
 0x2bc   :  { %298 = vsyncpa [#allocation3], 1 }
 0x2bd   :  { %299 = vsyncpa [#allocation6], 1 }
 0x2be   :  { %300 = vsyncpa [#allocation4], 1 }

</bundles_post_ra>
